<compile_context>
chip_gen: v5e
topology: v5e:2x2
jax: 0.10.0
libtpu: 0.0.40
codegen_flags: <defaults>
</compile_context>

<pallas_src>
import functools
import math

import jax
import jax.numpy as jnp
from jax.experimental import pallas as pl
from jax.experimental.pallas import tpu as pltpu


def _round_up(x, m):
    return (x + m - 1) // m * m


def _conv3x3_im2col_kernel(x_ref, w_ref, b_ref, o_ref, *, wp, l_out):
    """One batch element, stride-1 3x3 'same' conv in flattened-spatial layout.

    x_ref: (1, C_in, PF)      zero-padded image, spatial flattened with pitch wp
    w_ref: (C_out, 9*C_in)    weights, contraction ordered as (ky, kx, c_in)
    b_ref: (C_out, 1)         bias
    o_ref: (1, C_out, l_out)  flat output, l_out = H*wp (2 garbage cols per row,
                              dropped by the wrapper)
    """
    x = x_ref[0]  # (C_in, PF)

    # Build im2col: each 3x3 tap is a contiguous lane slice of the flat image.
    taps = []
    for ky in range(3):
        for kx in range(3):
            base = ky * wp + kx
            taps.append(x[:, base:base + l_out])          # (C_in, l_out)
    im2col = jnp.concatenate(taps, axis=0)                # (9*C_in, l_out)

    # Single lane-dense MXU matmul: (C_out, 9*C_in) @ (9*C_in, l_out).
    # TODO(synk): cast operands to bf16 (f32 accumulation) once the model is
    # known to tolerate it; kept f32 here to match the f32 reference exactly.
    acc = jnp.dot(w_ref[...], im2col, preferred_element_type=jnp.float32)
    acc = acc + b_ref[...]                                # (C_out, 1) broadcast
    o_ref[0] = acc.astype(o_ref.dtype)


def bottleneck_forward(x_nchw, weight_oihw, bias, *, stride=1):
    """Bottleneck forward.

    x_nchw:      (N, C_in, H, W)      float32
    weight_oihw: (C_out, C_in, 3, 3)  float32  (branch ch == output channel ch)
    bias:        (C_out,)             float32
    returns:     (N, C_out, H_out, W_out) with H_out = (H - 1)//stride + 1
    """
    n, c_in, h, w = x_nchw.shape
    c_out = weight_oihw.shape[0]

    wp = w + 2                       # padded row pitch
    l_out = h * wp                   # flat output length (incl. 2 garbage cols/row)
    pf = _round_up((h + 2) * wp + 2, 128)   # flat padded-input length (lane aligned)

    # --- glue: zero-pad (pad=1), flatten spatial to one lane axis ------------
    # TODO(synk): padding could be fused into the kernel via a VMEM scratch to
    # save this HBM pass on the input; kept in the wrapper for robustness.
    x_pad = jnp.pad(x_nchw, ((0, 0), (0, 0), (1, 1), (1, 1)))        # (N,Cin,H+2,W+2)
    x_flat = x_pad.reshape(n, c_in, (h + 2) * wp)
    x_flat = jnp.pad(x_flat, ((0, 0), (0, 0), (0, pf - (h + 2) * wp)))

    # Weights as one contiguous 2-D operand; K order (ky, kx, c_in) matches im2col.
    w2 = jnp.transpose(weight_oihw, (0, 2, 3, 1)).reshape(c_out, 9 * c_in)
    b2 = bias.reshape(c_out, 1)

    kernel = functools.partial(_conv3x3_im2col_kernel, wp=wp, l_out=l_out)

    y_flat = pl.pallas_call(
        kernel,
        out_shape=jax.ShapeDtypeStruct((n, c_out, l_out), jnp.float32),
        grid_spec=pltpu.PrefetchScalarGridSpec(
            num_scalar_prefetch=0,
            grid=(n,),
            in_specs=[
                pl.BlockSpec((1, c_in, pf), lambda i: (i, 0, 0)),
                pl.BlockSpec((c_out, 9 * c_in), lambda i: (0, 0)),
                pl.BlockSpec((c_out, 1), lambda i: (0, 0)),
            ],
            out_specs=pl.BlockSpec((1, c_out, l_out), lambda i: (i, 0, 0)),
        ),
        compiler_params=pltpu.CompilerParams(
            dimension_semantics=("parallel",),
        ),
    )(x_flat, w2, b2)

    # --- glue: un-flatten, drop the 2 wrap-around columns per row -> NCHW ----
    y = y_flat.reshape(n, c_out, h, wp)[:, :, :, :w]

    # stride: subsample of the stride-1 'same' conv (mathematically exact).
    # TODO(synk): for stride > 1, compute only the strided positions in-kernel.
    if stride != 1:
        y = y[:, :, ::stride, ::stride]
    return y


if __name__ == "__main__":
    key = jax.random.PRNGKey(0)
    N, C_in, H, W = 2, 4, 16, 16
    C_out = 8

    kx, kw, kb = jax.random.split(key, 3)
    x = jax.random.normal(kx, (N, C_in, H, W), jnp.float32)

    # Deterministic "branch" weights: branch ch -> output channel ch (OIHW).
    fan_in = C_in * 3 * 3
    weight = jax.random.normal(kw, (C_out, C_in, 3, 3), jnp.float32) / math.sqrt(fan_in)
    bias = 0.01 * jax.random.normal(kb, (C_out,), jnp.float32)

    for stride in (1, 2):
        y = bottleneck_forward(x, weight, bias, stride=stride)
        y = jax.block_until_ready(y)

        # Cross-check against XLA's conv (same semantics as the torch module).
        y_ref = jax.lax.conv_general_dilated(
            x, weight,
            window_strides=(stride, stride),
            padding=((1, 1), (1, 1)),
            dimension_numbers=("NCHW", "OIHW", "NCHW"),
            precision=jax.lax.Precision.HIGHEST,
        ) + bias[None, :, None, None]

        assert y.shape == y_ref.shape, (stride, y.shape, y_ref.shape)
        assert jnp.allclose(y, y_ref, atol=1e-3, rtol=1e-3), (
            stride, float(jnp.max(jnp.abs(y - y_ref)))
        )

    print("KERNEL_OK")
</pallas_src>

<mosaic_0001>
module attributes {stable_mosaic.version = 11 : i64} {
  func.func @_conv3x3_im2col_kernel(%arg0: i32, %arg1: memref<1x4x384xf32, #tpu.memory_space<vmem>>, %arg2: memref<8x36xf32, #tpu.memory_space<vmem>>, %arg3: memref<8x1xf32, #tpu.memory_space<vmem>>, %arg4: memref<1x8x288xf32, #tpu.memory_space<vmem>>) attributes {dimension_semantics = [#tpu.dimension_semantics<parallel>], iteration_bounds = array<i64: 2>, scalar_prefetch = 0 : i64, scratch_operands = 0 : i64, tpu.core_type = #tpu.core_type<tc>, window_params = [{transform_indices = @transform_0, window_bounds = array<i64: 1, 4, 384>}, {pipeline_mode = #tpu.pipeline_mode<synchronous>, transform_indices = @transform_1, window_bounds = array<i64: 8, 36>}, {pipeline_mode = #tpu.pipeline_mode<synchronous>, transform_indices = @transform_2, window_bounds = array<i64: 8, 1>}, {transform_indices = @transform_3, window_bounds = array<i64: 1, 8, 288>}]} {
    %c0 = arith.constant 0 : index
    %c0_0 = arith.constant 0 : index
    %c0_1 = arith.constant 0 : index
    %0 = vector.load %arg1[%c0, %c0_0, %c0_1] : memref<1x4x384xf32, #tpu.memory_space<vmem>>, vector<1x4x384xf32>
    %1 = vector.shape_cast %0 : vector<1x4x384xf32> to vector<4x384xf32>
    %2 = vector.extract_strided_slice %1 {offsets = [0, 0], sizes = [4, 288], strides = [1, 1]} : vector<4x384xf32> to vector<4x288xf32>
    %3 = vector.extract_strided_slice %1 {offsets = [0, 1], sizes = [4, 288], strides = [1, 1]} : vector<4x384xf32> to vector<4x288xf32>
    %4 = vector.extract_strided_slice %1 {offsets = [0, 2], sizes = [4, 288], strides = [1, 1]} : vector<4x384xf32> to vector<4x288xf32>
    %5 = vector.extract_strided_slice %1 {offsets = [0, 18], sizes = [4, 288], strides = [1, 1]} : vector<4x384xf32> to vector<4x288xf32>
    %6 = vector.extract_strided_slice %1 {offsets = [0, 19], sizes = [4, 288], strides = [1, 1]} : vector<4x384xf32> to vector<4x288xf32>
    %7 = vector.extract_strided_slice %1 {offsets = [0, 20], sizes = [4, 288], strides = [1, 1]} : vector<4x384xf32> to vector<4x288xf32>
    %8 = vector.extract_strided_slice %1 {offsets = [0, 36], sizes = [4, 288], strides = [1, 1]} : vector<4x384xf32> to vector<4x288xf32>
    %9 = vector.extract_strided_slice %1 {offsets = [0, 37], sizes = [4, 288], strides = [1, 1]} : vector<4x384xf32> to vector<4x288xf32>
    %10 = vector.extract_strided_slice %1 {offsets = [0, 38], sizes = [4, 288], strides = [1, 1]} : vector<4x384xf32> to vector<4x288xf32>
    %11 = tpu.concatenate %2, %3, %4, %5, %6, %7, %8, %9, %10 in 0 : vector<4x288xf32>, vector<4x288xf32>, vector<4x288xf32>, vector<4x288xf32>, vector<4x288xf32>, vector<4x288xf32>, vector<4x288xf32>, vector<4x288xf32>, vector<4x288xf32> -> vector<36x288xf32>
    %c0_2 = arith.constant 0 : index
    %c0_3 = arith.constant 0 : index
    %12 = vector.load %arg2[%c0_2, %c0_3] : memref<8x36xf32, #tpu.memory_space<vmem>>, vector<8x36xf32>
    %cst = arith.constant dense<0.000000e+00> : vector<8x288xf32>
    %13 = tpu.matmul %12, %11, %cst {dimension_numbers = #tpu.dot_dimension_numbers<[1], [0], [0], [1], [0, 0, 1, 1], [], []>} : vector<8x36xf32>, vector<36x288xf32>, vector<8x288xf32> -> vector<8x288xf32>
    %c0_4 = arith.constant 0 : index
    %c0_5 = arith.constant 0 : index
    %14 = vector.load %arg3[%c0_4, %c0_5] : memref<8x1xf32, #tpu.memory_space<vmem>>, vector<8x1xf32>
    %15 = vector.broadcast %14 : vector<8x1xf32> to vector<8x288xf32>
    %16 = arith.addf %13, %15 : vector<8x288xf32>
    %c0_6 = arith.constant 0 : index
    %c0_7 = arith.constant 0 : index
    %c0_8 = arith.constant 0 : index
    %17 = vector.load %arg4[%c0_6, %c0_7, %c0_8] : memref<1x8x288xf32, #tpu.memory_space<vmem>>, vector<1x8x288xf32>
    %18 = vector.shape_cast %17 : vector<1x8x288xf32> to vector<8x288xf32>
    %19 = vector.shape_cast %16 : vector<8x288xf32> to vector<1x8x288xf32>
    tpu.vector_store %arg4[%c0_6, %c0_7, %c0_8], %19 {strides = array<i32>} : memref<1x8x288xf32, #tpu.memory_space<vmem>>, vector<1x8x288xf32>,
    return
  }
  func.func @transform_0(%arg0: i32) -> (i32, i32, i32) {
    %c0_i32 = arith.constant 0 : i32
    %c0_i32_0 = arith.constant 0 : i32
    %c0_i32_1 = arith.constant 0 : i32
    return %arg0, %c0_i32, %c0_i32_0 : i32, i32, i32
  }
  func.func @transform_1(%arg0: i32) -> (i32, i32) {
    %c0_i32 = arith.constant 0 : i32
    %c0_i32_0 = arith.constant 0 : i32
    %c0_i32_1 = arith.constant 0 : i32
    return %c0_i32, %c0_i32_0 : i32, i32
  }
  func.func @transform_2(%arg0: i32) -> (i32, i32) {
    %c0_i32 = arith.constant 0 : i32
    %c0_i32_0 = arith.constant 0 : i32
    %c0_i32_1 = arith.constant 0 : i32
    return %c0_i32, %c0_i32_0 : i32, i32
  }
  func.func @transform_3(%arg0: i32) -> (i32, i32, i32) {
    %c0_i32 = arith.constant 0 : i32
    %c0_i32_0 = arith.constant 0 : i32
    %c0_i32_1 = arith.constant 0 : i32
    return %arg0, %c0_i32, %c0_i32_0 : i32, i32, i32
  }
}

</mosaic_0001>

<bundles_post_ra>
// kernel: tpu_custom_call.1
= control target key start
LH: loop header
LB: loop body
LE: loop exit
PB: predicated region body
PF: predicated region fallthrough
CT: control target
= control target key end

     0   :  { %8 = vsyncpa [#allocation3], 0  ;;  %s970_s0 = inlined_call_operand.hbm [shape: f32[2,4,384], index: 0, kind: input, shape index: {}]   ;;  %s971_s1 = inlined_call_operand.vmem [shape: f32[8,36], index: 1, kind: input, shape index: {}]   ;;  %s972_s2 = inlined_call_operand.vmem [shape: f32[8,1], index: 2, kind: input, shape index: {}]   ;;  %s973_s3 = inlined_call_operand.hbm [shape: f32[2,8,288], index: 3, kind: output, shape index: {}]  }
   0x1   :  { %10 = vsyncpa [#allocation3 + $0x1], 0 }
   0x2   :  { %11 = vsyncpa [#allocation4], 0 }
   0x3   :  { %13 = vsyncpa [#allocation4 + $0x1], 0  ;;  %s766_s12 = smov 0   ;;  %s768_s13 = smov 0  }
   0x4   :  { %s770_s14 = smov 0   ;;  %s772_s15 = smov 0  }
   0x5 LB: > { %s787_s16 = sadd.s32 4294967295, %s735_s15   ;;  %s528_s17 = sadd.s32 4294967294, %s735_s15   ;;  %s735_s15 = sphi %s772_s15, %s981_s15   ;;  %s731_s14 = sphi %s770_s14, %s980_s14   ;;  %s727_s13 = sphi %s768_s13, %s979_s13   ;;  %s723_s12 = sphi %s766_s12, %s978_s12  }
   0x6   : > { %s791_s18 = sadd.s32 1, %s735_s15   ;;  %s26_s19 = sadd.s32 1, %s731_s14 }
   0x7   : > { %s23_s20 = ssub.s32 %s735_s15, %s791_s18  ;;  %p33_p0 = scmp.ne.s32.totalorder %s731_s14, %s727_s13 }
   0x8   : > { %p24_p1 = scmp.eq.s32.totalorder %s23_s20, 0  ;;  %p34_p2 = scmp.eq.s32.totalorder %s735_s15, 0 }
   0x9   : > { %p39_p3 = scmp.ne.s32.totalorder %s727_s13, %s723_s12  ;;  %p40_p4 = scmp.eq.s32.totalorder %s787_s16, 0 }
   0xa   : > { %s803_s21 = scalar_select %p24_p1, %s731_s14, %s26_s19  }
   0xb   : > { %p35_p5 = por %p34_p2, %p33_p0  ;;  %p805_p6 = por %p40_p4, %p39_p3 }
   0xc   : > { %p105_p7 = scmp.eq.s32.totalorder %s787_s16, 1  ;;  %p111_p8 = scmp.eq.s32.totalorder %s528_s17, 1 }
   0xd   : > { %p530_p9 = scmp.ge.s32.totalorder %s735_s15, 2  ;;  %p559_p10 = scmp.lt.s32.totalorder %s735_s15, 2 }
   0xe   : > { %p812_p11 = por %p105_p7, %p33_p0  ;;  %p816_p12 = por %p111_p8, %p39_p3 }
   0xf   : > { %s137_s25 = sand.u32 1, %s731_s14   ;;  %s543_s26 = smul.u32 12, %s735_s15 }
  0x10   : > { %s542_s27 = smul.u32 12, %s137_s25  ;;  %p825_p13 = pnand %p559_p10, %p35_p5 }
  0x11   : > { %s146_s30 = scalar_lea.hbm %s970_s0, %s543_s26  ;;  %s138_s8 = scalar_lea.sflag [#allocation3], %s137_s25 }
  0x12   : > { %s148_s5 = sshll.u32 %s146_s30, 4  ;;  %s141_s6 = scalar_lea.vmem [#allocation2], %s542_s27  ;;  %s149_s5 = int_to_ptr.hbm [resolvable:$true] %s148_s5 }
  0x13   : > { %s150_s7 = sshll.u32 %s141_s6, 4  ;;  %s639_s9 = sshra.s32 %s149_s5, 4  ;;  %s151_s7 = int_to_ptr.vmem [resolvable:$true] %s150_s7  ;;  %s640_s9 = int_to_ptr.hbm [resolvable:$true] %s639_s9 }
  0x14   : > { %s641_s10 = scalar_lea.hbm %s640_s9, 12  ;;  %p643_p1 = pneg %p825_p13 }
  0x15   : > { %p642_p0 = scmp.ne.s32.totalorder %s640_s9, %s641_s10  ;;  %s646_s19 = scalar_lea.hbm %s970_s0, 24 }
  0x16   : > { %p647_p4 = scmp.lt.s32.totalorder %s640_s9, %s970_s0  ;;  %p648_p5 = scmp.lt.s32.totalorder %s646_s19, %s641_s10 }
  0x17   : > { %p644_p2 = pnand %p643_p1, %p642_p0 }
  0x18   : > { %p649_p7 = por %p648_p5, %p647_p4 }
  0x19   : > { %p645_p3 = pneg %p644_p2 }
  0x1b   : > { %p650_p8 = pnand %p649_p7, %p645_p3 }
  0x1d   : > { %653 = shalt.err (!%p650_p8)
}
  0x1e   : > { %554 = dma.hbm_to_vmem [thread:$0]  (!%p825_p13), %s149_s5, 192, %s151_s7, %s138_s8  }
  0x1f   : > { %p532_p10 = scmp.ge.s32.totalorder %s735_s15, 1  ;;  %p155_p0 = scmp.lt.s32.totalorder %s735_s15, 3 }
  0x21   : > { %p156_p1 = pnand %p532_p10, %p155_p0 }
  0x22   : > { %s842_s25 = sand.u32 (!%p156_p1), 1, %s727_s13  }
  0x23   : > { %159 = sbr.rel (%p156_p1) target bundleno = 391 (0x187), region = 32  ;;  %s162_s28 = scalar_lea.sflag (!%p156_p1), [#allocation3], %s842_s25 }
  0x24   : > { %s544_s27 = smul.u32 (!%p156_p1), 12, %s842_s25 }
  0x26   : > { %s165_s29 = scalar_lea.vmem (!%p156_p1), [#allocation2], %s544_s27 }
  0x28   : > { %714 = dma.done.wait (%p805_p6), %s162_s28, 192  }
  0x29   : > { %716 = vsyncadd (%p805_p6), %s162_s28, 4294967104  ;;  %v189_v0 = vld [vmem:[%s165_s29] sm:$0xff]  ;;  %v190_v1 = vld [vmem:[%s165_s29 + $0x8] sm:$0xf]  ;;  %s737_s22 = smov 127   ;;  %s738_s30 = smov 110  }
  0x2a   : > { %193 = vst [vmem:[#allocation1] ss:$2 sm:$0xff] %v189_v0  ;;  %s739_s4 = smov 126   ;;  %s740_s5 = smov 109   ;;  %v361_v44 = vld [vmem:[%s972_s2] sm:$0xff]  ;;  %v745_v46 = vmov 0  }
  0x2b   : > { %195 = vst [vmem:[#allocation1 + $0x10] ss:$2 sm:$0xff] %v190_v1  ;;  %s741_s6 = smov 108   ;;  %s742_s7 = smov 92   ;;  %637 = vset.pattern.permute.xlu2 %v745_v46  ;;  %638 = vset.pattern.permute.xlu0 %v745_v46  ;;  %vm307_vm0 = vcmask 752640   ;;  %vm326_vm1 = vcmask 744448  }
  0x2c   : > { %s743_s8 = smov 91   ;;  %s744_s9 = smov 90   ;;  %vm344_vm2 = vcmask 736256   ;;  %vm347_vm3 = vcmask 1043456   ;;  %vm270_vm4 = vcmask 891904   ;;  %vm289_vm5 = vcmask 883712  }
  0x2d   : > { %v360_v63 = vld [vmem:[%s971_s1] sm:$0xff]  ;;  %vm367_vm6 = vcmask 293888   ;;  %vm233_vm7 = vcmask 1031168   ;;  %vm252_vm8 = vcmask 900096   ;;  %vm215_vm9 = vcmask 1039360   ;;  %s545_s20 = smul.u32 24, %s842_s25 }
  0x2e   : > { %vm439_vm10 = vcmask 261120   ;;  %s546_s27 = smul.u32 24, %s787_s16 }
  0x2f   : > { %s188_s26 = scalar_lea.vmem [#allocation5], %s545_s20 }
  0x31   : > { %v850_v2 = vld.sshfl [vmem:[#allocation1] sm:$0xff pattern:$0x75316420]  ;;  %v852_v3 = vld.sshfl [vmem:[#allocation1 + $0x8] sm:$0xff pattern:$0x75316420] }
  0x32   : > { %v854_v4 = vld.sshfl [vmem:[#allocation1 + $0x10] sm:$0xff pattern:$0x75316420]  ;;  %203 = vst [vmem:[#allocation1 + $0x1] ss:$2 sm:$0xff] %v189_v0 }
  0x33   : > { %205 = vst [vmem:[#allocation1 + $0x11] ss:$2 sm:$0xff] %v190_v1 }
  0x39   : > { %v206_v5 = vld.sshfl [vmem:[#allocation1] sm:$0xff pattern:$0x75316420]  ;;  %v856_v6 = vld.sshfl [vmem:[#allocation1 + $0x8] sm:$0xff pattern:$0x75316420] }
  0x3a   : > { %v208_v7 = vld.sshfl [vmem:[#allocation1 + $0x10] sm:$0xff pattern:$0x75316420]  ;;  %221 = vst [vmem:[#allocation1] ss:$2 sm:$0xff] %v189_v0 }
  0x3b   : > { %223 = vst [vmem:[#allocation1 + $0x10] ss:$2 sm:$0xff] %v190_v1  ;;  %v602_v11 = vpack.i.bf16 %v206_v5, %v208_v7 }
  0x3d   : > { %603 = vrot.lane.b32.xlu2 %v602_v11, %s737_s22 }
  0x41   : > { %v224_v8 = vld.sshfl [vmem:[#allocation1] sm:$0xff pattern:$0x75316420]  ;;  %v225_v9 = vld.sshfl [vmem:[#allocation1 + $0x8] sm:$0xff pattern:$0x75316420] }
  0x42   : > { %v226_v10 = vld.sshfl [vmem:[#allocation1 + $0x10] sm:$0xff pattern:$0x75316420]  ;;  %240 = vst [vmem:[#allocation1 + $0x1] ss:$2 sm:$0xff] %v189_v0 }
  0x43   : > { %242 = vst [vmem:[#allocation1 + $0x11] ss:$2 sm:$0xff] %v190_v1  ;;  %v607_v16 = vpack.i.bf16 %v224_v8, %v226_v10 }
  0x45   : > { %608 = vrot.lane.b32.xlu2 %v607_v16, %s739_s4 }
  0x49   : > { %v243_v12 = vld.sshfl [vmem:[#allocation1] sm:$0xff pattern:$0x75316420]  ;;  %v244_v13 = vld.sshfl [vmem:[#allocation1 + $0x8] sm:$0xff pattern:$0x75316420] }
  0x4a   : > { %v245_v14 = vld.sshfl [vmem:[#allocation1 + $0x10] sm:$0xff pattern:$0x75316420]  ;;  %258 = vst [vmem:[#allocation1] ss:$2 sm:$0xff] %v189_v0 }
  0x4b   : > { %260 = vst [vmem:[#allocation1 + $0x10] ss:$2 sm:$0xff] %v190_v1  ;;  %v612_v15 = vpack.i.bf16 %v243_v12, %v245_v14 }
  0x4d   : > { %613 = vrot.lane.b32.xlu0 %v612_v15, %s738_s30 }
  0x51   : > { %v261_v17 = vld.sshfl [vmem:[#allocation1] sm:$0xff pattern:$0x75316420]  ;;  %v262_v18 = vld.sshfl [vmem:[#allocation1 + $0x8] sm:$0xff pattern:$0x75316420] }
  0x52   : > { %v263_v19 = vld.sshfl [vmem:[#allocation1 + $0x10] sm:$0xff pattern:$0x75316420]  ;;  %277 = vst [vmem:[#allocation1 + $0x1] ss:$2 sm:$0xff] %v189_v0 }
  0x53   : > { %279 = vst [vmem:[#allocation1 + $0x11] ss:$2 sm:$0xff] %v190_v1  ;;  %v617_v20 = vpack.i.bf16 %v261_v17, %v263_v19 }
  0x55   : > { %618 = vrot.lane.b32.xlu1 %v617_v20, %s740_s5 }
  0x59   : > { %v280_v21 = vld.sshfl [vmem:[#allocation1] sm:$0xff pattern:$0x75316420]  ;;  %v281_v22 = vld.sshfl [vmem:[#allocation1 + $0x8] sm:$0xff pattern:$0x75316420] }
  0x5a   : > { %v282_v23 = vld.sshfl [vmem:[#allocation1 + $0x10] sm:$0xff pattern:$0x75316420]  ;;  %295 = vst [vmem:[#allocation1] ss:$2 sm:$0xff] %v189_v0 }
  0x5b   : > { %297 = vst [vmem:[#allocation1 + $0x10] ss:$2 sm:$0xff] %v190_v1  ;;  %v622_v24 = vpack.i.bf16 %v280_v21, %v282_v23 }
  0x5d   : > { %623 = vrot.lane.b32.xlu2 %v622_v24, %s741_s6 }
  0x61   : > { %v298_v25 = vld.sshfl [vmem:[#allocation1] sm:$0xff pattern:$0x75316420]  ;;  %v299_v26 = vld.sshfl [vmem:[#allocation1 + $0x8] sm:$0xff pattern:$0x75316420] }
  0x62   : > { %v300_v27 = vld.sshfl [vmem:[#allocation1 + $0x10] sm:$0xff pattern:$0x75316420]  ;;  %314 = vst [vmem:[#allocation1 + $0x1] ss:$2 sm:$0xff] %v189_v0 }
  0x63   : > { %316 = vst [vmem:[#allocation1 + $0x11] ss:$2 sm:$0xff] %v190_v1  ;;  %v627_v28 = vpack.i.bf16 %v298_v25, %v300_v27 }
  0x65   : > { %628 = vrot.lane.b32.xlu0 %v627_v28, %s742_s7 }
  0x69   : > { %v317_v29 = vld.sshfl [vmem:[#allocation1] sm:$0xff pattern:$0x75316420]  ;;  %v318_v30 = vld.sshfl [vmem:[#allocation1 + $0x8] sm:$0xff pattern:$0x75316420] }
  0x6a   : > { %v319_v31 = vld.sshfl [vmem:[#allocation1 + $0x10] sm:$0xff pattern:$0x75316420]  ;;  %332 = vst [vmem:[#allocation1] ss:$2 sm:$0xff] %v189_v0 }
  0x6b   : > { %v632_v32 = vpack.i.bf16 %v317_v29, %v319_v31  ;;  %334 = vst [vmem:[#allocation1 + $0x10] ss:$2 sm:$0xff] %v190_v1 }
  0x6d   : > { %303 = vrot.lane.b32.xlu0 %v299_v26, %s742_s7  ;;  %633 = vrot.lane.b32.xlu1 %v632_v32, %s743_s8 }
  0x71   : > { %v336_v33 = vld.sshfl [vmem:[#allocation1 + $0x8] sm:$0xff pattern:$0x75316420]  ;;  %v335_v35 = vld.sshfl [vmem:[#allocation1] sm:$0xff pattern:$0x75316420] }
  0x72   : > { %v337_v34 = vld.sshfl [vmem:[#allocation1 + $0x10] sm:$0xff pattern:$0x75316420]  ;;  %340 = vrot.lane.b32.xlu2 %v336_v33, %s744_s9 }
  0x75   : > { %342 = vrot.lane.b32.xlu0 %v337_v34, %s744_s9  ;;  %322 = vrot.lane.b32.xlu1 %v318_v30, %s743_s8 }
  0x7a   : > { %229 = vrot.lane.b32.xlu2 %v225_v9, %s739_s4 }
  0x7d   : > { %266 = vrot.lane.b32.xlu0 %v262_v18, %s740_s5  ;;  %285 = vrot.lane.b32.xlu1 %v281_v22, %s741_s6  ;;  %s442_s5 = scalar_lea.sflag [#allocation4], %s842_s25 }
  0x82   : > { %364 = vperm.xlu2 %637, %v361_v44  }
  0x85   : > { %248 = vrot.lane.b32.xlu0 %v244_v13, %s738_s30  ;;  %338 = vrot.lane.b32.xlu1 %v335_v35, %s744_s9  ;;  %s455_s30 = sshll.u32 %s188_s26, 4  ;;  %s689_s9 = scalar_lea.hbm %s973_s3, 48  ;;  %s456_s30 = int_to_ptr.vmem [resolvable:$true] %s455_s30 }
  0x8d   : > { %211 = vrot.lane.b32.xlu1 %v856_v6, %s737_s22  ;;  %s453_s22 = scalar_lea.hbm %s973_s3, %s546_s27 }
  0x8e   : > { %s457_s4 = sshll.u32 %s453_s22, 4  ;;  %s458_s4 = int_to_ptr.hbm [resolvable:$true] %s457_s4 }
  0x8f   : > { %s683_s6 = sshra.s32 %s458_s4, 4  ;;  %s684_s6 = int_to_ptr.hbm [resolvable:$true] %s683_s6 }
  0x90   : > { %s685_s7 = scalar_lea.hbm %s684_s6, 24  ;;  %p690_p3 = scmp.lt.s32.totalorder %s684_s6, %s973_s3 }
  0x91   : > { %p686_p6 = scmp.ne.s32.totalorder %s684_s6, %s685_s7  ;;  %p691_p4 = scmp.lt.s32.totalorder %s689_s9, %s685_s7 }
  0x93   : > { %p687_p13 = pnand %p686_p6, %p812_p11  ;;  %p692_p5 = por %p691_p4, %p690_p3 }
  0x95   : > { %p688_p2 = pneg %p687_p13 }
  0x97   : > { %v867_v36 = vpop.permute.xlu2 %603  ;;  %p693_p7 = pnand %p692_p5, %p688_p2 }
  0x98   : > { %v605_v60 = vunpack.i.l.bf16 %v867_v36  ;;  %v606_v29 = vunpack.i.h.bf16 %v867_v36 }
  0x9a   : > { %v350_v5 = vsel %vm347_vm3, %v854_v4, %v605_v60 }
  0x9f   : > { %v871_v38 = vpop.permute.xlu2 %608 }
  0xa0   : > { %v610_v56 = vunpack.i.l.bf16 %v871_v38  ;;  %v611_v4 = vunpack.i.h.bf16 %v871_v38 }
  0xb7   : > { %v877_v41 = vpop.permute.xlu2 %623 }
  0xb8   : > { %v625_v50 = vunpack.i.l.bf16 %v877_v41  ;;  %v626_v9 = vunpack.i.h.bf16 %v877_v41 }
  0xbf   : > { %v869_v37 = vpop.permute.xlu0 %613 }
  0xc0   : > { %v615_v57 = vunpack.i.l.bf16 %v869_v37  ;;  %v616_v17 = vunpack.i.h.bf16 %v869_v37 }
  0xc2   : > { %v353_v62 = vsel %vm347_vm3, %v610_v56, %v615_v57 }
  0xc7   : > { %v873_v39 = vpop.permute.xlu1 %618 }
  0xc8   : > { %v620_v49 = vunpack.i.l.bf16 %v873_v39  ;;  %v621_v13 = vunpack.i.h.bf16 %v873_v39 }
  0xca   : > { %v356_v61 = vsel %vm347_vm3, %v620_v49, %v625_v50 }
  0xcc   : > { %v341_v48 = vpop.permute.xlu2 %340 }
  0xd4   : > { %v230_v12 = vpop.permute.xlu2 %229 }
  0xd5   : > { %v235_v18 = vsel %vm233_vm7, %v230_v12, %v610_v56  ;;  %v234_v28 = vsel %vm233_vm7, %v611_v4, %v230_v12 }
  0xd7   : > { %v875_v40 = vpop.permute.xlu0 %628 }
  0xd8   : > { %v630_v45 = vunpack.i.l.bf16 %v875_v40  ;;  %v631_v10 = vunpack.i.h.bf16 %v875_v40 }
  0xdc   : > { %v365_v36 = vpop.permute.xlu2 %364 }
  0xdf   : > { %v879_v42 = vpop.permute.xlu0 %303  ;;  %v634_v43 = vpop.permute.xlu1 %633 }
  0xe0   : > { %v635_v47 = vunpack.i.l.bf16 %v634_v43  ;;  %v309_v53 = vsel %vm307_vm0, %v879_v42, %v630_v45  ;;  %v636_v11 = vunpack.i.h.bf16 %v634_v43  ;;  %v308_v21 = vsel %vm307_vm0, %v631_v10, %v879_v42 }
  0xe2   : > { %v359_v58 = vsel %vm347_vm3, %v630_v45, %v635_v47 }
  0xe7   : > { %v343_v51 = vpop.permute.xlu0 %342  ;;  %v323_v52 = vpop.permute.xlu1 %322 }
  0xe8   : > { %v328_v54 = vsel %vm326_vm1, %v323_v52, %v635_v47  ;;  %537 = vmatpush.msk.msra.mxu2 %vm347_vm3, %v343_v51  ;;  %v346_v55 = vsel %vm344_vm2, %v341_v48, %v343_v51  ;;  %v327_v14 = vsel %vm326_vm1, %v636_v11, %v323_v52 }
  0xe9   : > { %535 = vmatpush.msk.msra.mxu1 %vm347_vm3, %v346_v55  ;;  %v358_v59 = vsel %vm347_vm3, %v309_v53, %v328_v54  ;;  %v357_v25 = vsel %vm347_vm3, %v308_v21, %v327_v14 }
  0xea   : > { %429 = vmatpush.msra.mxu2 %v359_v58 }
  0xeb   : > { %409 = vmatpush.msra.mxu1 %v358_v59 }
  0xec   : > { %430 = vmatpush.msra.mxu2 %v356_v61 }
  0xee   : > { %431 = vmatpush.msra.mxu2 %v353_v62 }
  0xef   : > { %v267_v0 = vpop.permute.xlu0 %266  ;;  %v286_v1 = vpop.permute.xlu1 %285 }
  0xf0   : > { %v272_v6 = vsel %vm270_vm4, %v267_v0, %v620_v49  ;;  %v291_v7 = vsel %vm289_vm5, %v286_v1, %v625_v50  ;;  %432 = vmatpush.msra.mxu2 %v350_v5  ;;  %v271_v22 = vsel %vm270_vm4, %v621_v13, %v267_v0  ;;  %v290_v23 = vsel %vm289_vm5, %v626_v9, %v286_v1 }
  0xf1   : > { %v355_v8 = vsel %vm347_vm3, %v272_v6, %v291_v7  ;;  %538 = vmatmul.msk.f32.vlgmr.msra.gmra.mxu2 %vm367_vm6, %v360_v63  ;;  %v354_v27 = vsel %vm347_vm3, %v271_v22, %v290_v23 }
  0xf2   : > { %410 = vmatpush.msra.mxu1 %v355_v8 }
  0xf7   : > { %v249_v15 = vpop.permute.xlu0 %248  ;;  %v339_v16 = vpop.permute.xlu1 %338 }
  0xf8   : > { %v254_v19 = vsel %vm252_vm8, %v249_v15, %v615_v57  ;;  %v345_v20 = vsel %vm344_vm2, %v339_v16, %v341_v48  ;;  %v253_v26 = vsel %vm252_vm8, %v616_v17, %v249_v15 }
  0xf9   : > { %533 = vmatpush.msk.msra.mxu0 %vm347_vm3, %v345_v20  ;;  %v352_v24 = vsel %vm347_vm3, %v235_v18, %v254_v19  ;;  %v351_v30 = vsel %vm347_vm3, %v234_v28, %v253_v26 }
  0xfa   : > { %411 = vmatpush.msra.mxu1 %v352_v24 }
  0xfb   : > { %389 = vmatpush.msra.mxu0 %v357_v25 }
  0xfd   : > { %390 = vmatpush.msra.mxu0 %v354_v27 }
  0xff   : > { %391 = vmatpush.msra.mxu0 %v351_v30  ;;  %v212_v31 = vpop.permute.xlu1 %211 }
 0x100   : > { %v216_v32 = vsel %vm215_vm9, %v606_v29, %v212_v31  ;;  %v217_v33 = vsel %vm215_vm9, %v212_v31, %v605_v60 }
 0x101   : > { %v348_v34 = vsel %vm347_vm3, %v850_v2, %v216_v32  ;;  %v349_v35 = vsel %vm347_vm3, %v852_v3, %v217_v33 }
 0x102   : > { %392 = vmatpush.msra.mxu0 %v348_v34  ;;  %412 = vmatpush.msra.mxu1 %v349_v35 }
 0x103   : > { %534 = vmatmul.msk.f32.vlgmr.msra.gmra.mxu0 %vm367_vm6, %v360_v63  ;;  %536 = vmatmul.msk.f32.vlgmr.msra.gmra.mxu1 %vm367_vm6, %v360_v63 }
 0x174   : > { %v434_v37 = vpop.f32.mrf.mxu2 }
 0x175   : > { %v435_v38 = vadd.f32 %v434_v37, %v365_v36 }
 0x177   : > { %440 = vst.msk [vmem:[%s188_s26 + $0x10] sm:$0xff] %vm439_vm10, %v435_v38 }
 0x180   : > { %v394_v2 = vpop.f32.mrf.mxu0  ;;  %v414_v3 = vpop.f32.mrf.mxu1 }
 0x181   : > { %v395_v39 = vadd.f32 %v394_v2, %v365_v36  ;;  %v415_v40 = vadd.f32 %v414_v3, %v365_v36 }
 0x183   : > { %437 = vst [vmem:[%s188_s26] sm:$0xff] %v395_v39 }
 0x184   : > { %438 = vst [vmem:[%s188_s26 + $0x8] sm:$0xff] %v415_v40 }
 0x185   : > { %696 = shalt.err (!%p693_p7)
}
 0x186   : > { %549 = dma.vmem_to_hbm [thread:$0]  (%p812_p11), %s456_s30, 384, %s458_s4, %s442_s5  }
 0x187 PF: > { %s469_s25 = sand.u32 1, %s723_s12   ;;  %p556_p8 = pnand %p530_p9, %p816_p12 }
 0x188   : > { %s470_s17 = scalar_lea.sflag [#allocation4], %s469_s25 }
 0x189   : > { %p557_p10 = pneg %p556_p8 }
 0x18b   : > { %718 = dma.done.wait (%p557_p10), %s470_s17, 384  }
 0x18c   : > { %720 = vsyncadd (%p557_p10), %s470_s17, 4294966912  ;;  %p16_p0 = scmp.ge.s32.totalorder %s791_s18, 4   ;;  %s978_s12 = smov %s727_s13 }
 0x18d   : > { %s979_s13 = smov %s731_s14  ;;  %s980_s14 = smov %s803_s21 }
 0x18e   : > { %s981_s15 = smov %s791_s18  ;;  %18 = sbr.rel (!%p16_p0) target bundleno = 5 (0x5), region = 90 }
 0x193   :  { %476 = vsyncpa [#allocation3], 1 }
 0x194   :  { %478 = vsyncpa [#allocation3 + $0x1], 1 }
 0x195   :  { %479 = vsyncpa [#allocation4], 1 }
 0x196   :  { %481 = vsyncpa [#allocation4 + $0x1], 1 }

</bundles_post_ra>
